<compile_context>
chip_gen: v7x
topology: tpu7x:2x2x1
jax: 0.10.0
libtpu: 0.0.40
codegen_flags: <defaults>
</compile_context>

<pallas_src>
import numpy as np

import jax
import jax.numpy as jnp
from jax.experimental import pallas as pl
from jax.experimental.pallas import tpu as pltpu

BN_EPS = 1e-5


# ----------------------------------------------------------------------------
# Fused kernel
# ----------------------------------------------------------------------------
def _bn_relu(acc, gamma, beta):
    """Train-mode BatchNorm (biased stats over rows) + ReLU, two-pass statistics."""
    inv_n = 1.0 / acc.shape[0]
    mean = jnp.sum(acc, axis=0, keepdims=True) * inv_n
    centered = acc - mean
    var = jnp.sum(centered * centered, axis=0, keepdims=True) * inv_n
    scale = jax.lax.rsqrt(var + BN_EPS) * gamma          # EUP rsqrt
    return jnp.maximum(centered * scale + beta, 0.0)


def disc_fused_kernel(p1_ref, w1_ref, b1_ref, g1_ref, be1_ref,
                      sel_ref, w2_ref, b2_ref, g2_ref, be2_ref,
                      wl_ref, bl_ref, o_ref):
    """Whole Discriminator forward.

    p1_ref  : (N*S1, 9*Cin)  bf16  im2col patches of the input (3x3, stride 2, pad 1)
    w1_ref  : (9*Cin, 16)    bf16  conv1 weight, rows ordered (kh*3+kw)*Cin + c
    sel_ref : (9*S2, S1)     bf16  0/1 PER-BATCH gather matrix, rows ordered t*S2 + p
    w2_ref  : (9*16, 32)     bf16  conv2 weight, rows ordered (kh*3+kw)*16 + c
    wl_ref  : (S2, 32)       f32   linear weight (NCHW flatten folded), NOT batch-tiled
    b*/g*/be*/bl             f32   conv biases, BN gamma/beta, linear bias
    o_ref   : (N, 1)         f32
    """
    n = o_ref.shape[0]

    # ---------------- conv1 + BN1 + ReLU : one im2col matmul ----------------
    acc1 = jnp.dot(p1_ref[...], w1_ref[...], preferred_element_type=jnp.float32)
    h1 = _bn_relu(acc1 + b1_ref[...], g1_ref[...], be1_ref[...])       # (N*S1, 16) f32
    h1_bf = h1.astype(jnp.bfloat16)      # 0/1 gather of bf16 values stays exact

    s1 = h1.shape[0] // n
    s2 = sel_ref.shape[0] // 9
    sel = sel_ref[...]                                                 # (9*S2, S1)

    # ---------------- conv2 + BN2 + ReLU ----------------
    # Per batch element (static unroll, sublane-aligned slices): one gather matmul
    # stacks the 9 stride-2 taps (padding taps are all-zero sel rows); the taps are
    # lane-concatenated so conv2 becomes a single (N*S2, 144) x (144, 32) MXU push.
    wides = []
    for b in range(n):
        stacked = jnp.dot(sel, h1_bf[b * s1:(b + 1) * s1, :],
                          preferred_element_type=jnp.float32)          # (9*S2, 16)
        wides.append(jnp.concatenate(
            [stacked[t * s2:(t + 1) * s2, :] for t in range(9)], axis=1))  # (S2, 144)
    wide = jnp.concatenate(wides, axis=0).astype(jnp.bfloat16)         # (N*S2, 144)
    acc2 = jnp.dot(wide, w2_ref[...], preferred_element_type=jnp.float32)
    h2 = _bn_relu(acc2 + b2_ref[...], g2_ref[...], be2_ref[...])       # (N*S2, 32) f32

    # ---------------- flatten + Linear + Sigmoid ----------------
    # Lane-reduce first (XLU), then per-batch segment sums over static sublane slices;
    # no (N*S2,32)->(N,S2,32) reshape and no batch-tiled linear weight.
    wl = wl_ref[...]                                                   # (S2, 32)
    zs = []
    for b in range(n):
        prod = h2[b * s2:(b + 1) * s2, :] * wl
        row = jnp.sum(prod, axis=1, keepdims=True)                     # (S2, 1)
        zs.append(jnp.sum(row, axis=0, keepdims=True))                 # (1, 1)
    z = jnp.concatenate(zs, axis=0) + bl_ref[...]                      # (N, 1)
    o_ref[...] = 1.0 / (1.0 + jnp.exp(-z))


# ----------------------------------------------------------------------------
# Wrapper: layout plumbing done once, single pallas_call
# ----------------------------------------------------------------------------
def _conv2_gather_matrix(h1, w1, h2, w2):
    """Batch-independent 0/1 matrix S of shape (9*S2, S1).

    Row t*S2 + p (p = oi*W2 + oj, t = kh*3 + kw) selects the conv1-output row (within
    one batch element) feeding tap (kh, kw) of conv2 output position (oi, oj); rows for
    padding taps are all-zero.  Built with numpy at trace time (static shapes)."""
    s1, s2 = h1 * w1, h2 * w2
    sel = np.zeros((9 * s2, s1), np.float32)
    for oi in range(h2):
        for oj in range(w2):
            p = oi * w2 + oj
            for kh in range(3):
                for kw in range(3):
                    ri, rj = 2 * oi - 1 + kh, 2 * oj - 1 + kw
                    if 0 <= ri < h1 and 0 <= rj < w1:
                        sel[(kh * 3 + kw) * s2 + p, ri * w1 + rj] = 1.0
    return sel


def _im2col_stride2(x_nchw):
    """3x3 / stride-2 / pad-1 patches of an NCHW input, built in XLA on the tiny raw
    input. Returns (N*Ho*Wo, 9*C), columns ordered (kh*3+kw)*C + c."""
    n, c, h, w = x_nchw.shape
    ho, wo = h // 2, w // 2
    xp = jnp.pad(x_nchw, ((0, 0), (0, 0), (1, 1), (1, 1)))
    taps = [xp[:, :, kh:kh + 2 * ho:2, kw:kw + 2 * wo:2]
            for kh in range(3) for kw in range(3)]            # 9 x (N, C, Ho, Wo)
    p = jnp.stack(taps, axis=-1)                              # (N, C, Ho, Wo, 9)
    p = jnp.transpose(p, (0, 2, 3, 4, 1))                     # (N, Ho, Wo, 9, C)
    return p.reshape(n * ho * wo, 9 * c)


@jax.jit
def discriminator_forward(x_nchw, params):
    """x_nchw: (N, C, H, W) like PyTorch; returns (N, 1) in [0, 1]."""
    n, c, h, w = x_nchw.shape
    h1w, w1w = h // 2, w // 2
    h2w, w2w = h1w // 2, w1w // 2
    c1o = params["w1"].shape[-1]          # 16
    c2o = params["w2"].shape[-1]          # 32
    s2 = h2w * w2w

    patches1 = _im2col_stride2(x_nchw).astype(jnp.bfloat16)            # (N*S1, 9*C)
    # sel is 0/1, so the bf16 cast is lossless and halves its DMA / VMEM footprint.
    sel = jnp.asarray(_conv2_gather_matrix(h1w, w1w, h2w, w2w),
                      dtype=jnp.bfloat16)                              # (9*S2, S1)

    w1r = params["w1"].reshape(9 * c, c1o).astype(jnp.bfloat16)
    w2r = params["w2"].reshape(9 * c1o, c2o).astype(jnp.bfloat16)
    b1 = params["b1"].reshape(1, c1o).astype(jnp.float32)
    g1 = params["g1"].reshape(1, c1o).astype(jnp.float32)
    be1 = params["be1"].reshape(1, c1o).astype(jnp.float32)
    b2 = params["b2"].reshape(1, c2o).astype(jnp.float32)
    g2 = params["g2"].reshape(1, c2o).astype(jnp.float32)
    be2 = params["be2"].reshape(1, c2o).astype(jnp.float32)
    # Fold PyTorch's out.view(N, -1) NCHW flatten into the linear weight (one permute
    # at trace time); do NOT tile it over batch -- the kernel broadcasts it per batch.
    wl_mat = params["wl"].reshape(c2o, s2).T.astype(jnp.float32)        # (S2, 32)
    bl = params["bl"].reshape(1, 1).astype(jnp.float32)

    args = (patches1, w1r, b1, g1, be1, sel, w2r, b2, g2, be2, wl_mat, bl)

    # No grid: single invocation (BN stats are global), whole arrays resident in VMEM,
    # no pipelining => every operand is single-buffered (the grid=(1,) double-buffering
    # of the old version bought zero overlap and doubled VMEM pressure).
    vmem_spec = pl.BlockSpec(memory_space=pltpu.MemorySpace.VMEM)

    return pl.pallas_call(
        disc_fused_kernel,
        out_shape=jax.ShapeDtypeStruct((n, 1), jnp.float32),
        in_specs=[vmem_spec] * len(args),
        out_specs=vmem_spec,
        compiler_params=pltpu.CompilerParams(vmem_limit_bytes=32 * 1024 * 1024),
    )(*args)


# ----------------------------------------------------------------------------
# Pure-JAX reference (for correctness check of the Pallas path)
# ----------------------------------------------------------------------------
def reference_forward(x_nchw, params):
    def conv_bn_relu_ref(x, w, b, g, be):
        y = jax.lax.conv_general_dilated(
            x, w, window_strides=(2, 2), padding=((1, 1), (1, 1)),
            dimension_numbers=("NHWC", "HWIO", "NHWC"))
        y = y + b
        mean = jnp.mean(y, axis=(0, 1, 2), keepdims=True)
        var = jnp.mean(jnp.square(y - mean), axis=(0, 1, 2), keepdims=True)
        y = (y - mean) * jax.lax.rsqrt(var + BN_EPS) * g + be
        return jnp.maximum(y, 0.0)

    x = jnp.transpose(x_nchw, (0, 2, 3, 1))
    h = conv_bn_relu_ref(x, params["w1"], params["b1"], params["g1"], params["be1"])
    h = conv_bn_relu_ref(h, params["w2"], params["b2"], params["g2"], params["be2"])
    n = h.shape[0]
    flat = jnp.transpose(h, (0, 3, 1, 2)).reshape(n, -1)   # PyTorch (C, H, W) flatten
    z = flat @ params["wl"] + params["bl"]
    return jax.nn.sigmoid(z)


# ----------------------------------------------------------------------------
# Deterministic parameter init (PyTorch default-style uniform bounds)
# ----------------------------------------------------------------------------
def init_params(key, channels, img_size):
    ks = jax.random.split(key, 6)
    feat = 32 * (img_size // 4) ** 2

    def u(k, shape, fan_in):
        bound = 1.0 / (fan_in ** 0.5)
        return jax.random.uniform(k, shape, jnp.float32, -bound, bound)

    return {
        "w1": u(ks[0], (3, 3, channels, 16), channels * 9),
        "b1": u(ks[1], (16,), channels * 9),
        "g1": jnp.ones((16,), jnp.float32),
        "be1": jnp.zeros((16,), jnp.float32),
        "w2": u(ks[2], (3, 3, 16, 32), 16 * 9),
        "b2": u(ks[3], (32,), 16 * 9),
        "g2": jnp.ones((32,), jnp.float32),
        "be2": jnp.zeros((32,), jnp.float32),
        "wl": u(ks[4], (feat, 1), feat),
        "bl": u(ks[5], (1,), feat),
    }


if __name__ == "__main__":
    # MNIST-GAN-style shapes: opt.channels=1, opt.img_size=16, batch=2.
    batch, channels, img_size = 2, 1, 16

    key = jax.random.PRNGKey(0)
    kx, kp = jax.random.split(key)
    x = jax.random.normal(kx, (batch, channels, img_size, img_size), jnp.float32)
    params = init_params(kp, channels, img_size)

    out = jax.block_until_ready(discriminator_forward(x, params))
    ref = reference_forward(x, params)

    assert out.shape == (batch, 1), out.shape
    assert bool(jnp.all(jnp.isfinite(out)))
    # Tolerance covers bf16 MXU operands (f32 accumulation) vs. XLA's f32 conv path;
    # real layout/indexing bugs produce O(0.1) deviations.
    assert bool(jnp.allclose(out, ref, atol=5e-3, rtol=1e-2)), (out, ref)

    print("KERNEL_OK")
</pallas_src>

<mosaic_0001>
module attributes {stable_mosaic.version = 11 : i64} {
  func.func @disc_fused_kernel(%arg0: memref<128x9xbf16, #tpu.memory_space<vmem>>, %arg1: memref<9x16xbf16, #tpu.memory_space<vmem>>, %arg2: memref<1x16xf32, #tpu.memory_space<vmem>>, %arg3: memref<1x16xf32, #tpu.memory_space<vmem>>, %arg4: memref<1x16xf32, #tpu.memory_space<vmem>>, %arg5: memref<144x64xbf16, #tpu.memory_space<vmem>>, %arg6: memref<144x32xbf16, #tpu.memory_space<vmem>>, %arg7: memref<1x32xf32, #tpu.memory_space<vmem>>, %arg8: memref<1x32xf32, #tpu.memory_space<vmem>>, %arg9: memref<1x32xf32, #tpu.memory_space<vmem>>, %arg10: memref<16x32xf32, #tpu.memory_space<vmem>>, %arg11: memref<1x1xf32, #tpu.memory_space<vmem>>, %arg12: memref<2x1xf32, #tpu.memory_space<vmem>>) attributes {dimension_semantics = [], scalar_prefetch = 0 : i64, scratch_operands = 0 : i64, tpu.core_type = #tpu.core_type<tc>} {
    %c0 = arith.constant 0 : index
    %c0_0 = arith.constant 0 : index
    %0 = vector.load %arg0[%c0, %c0_0] : memref<128x9xbf16, #tpu.memory_space<vmem>>, vector<128x9xbf16>
    %c0_1 = arith.constant 0 : index
    %c0_2 = arith.constant 0 : index
    %1 = vector.load %arg1[%c0_1, %c0_2] : memref<9x16xbf16, #tpu.memory_space<vmem>>, vector<9x16xbf16>
    %cst = arith.constant dense<0.000000e+00> : vector<128x16xf32>
    %2 = tpu.matmul %0, %1, %cst {dimension_numbers = #tpu.dot_dimension_numbers<[1], [0], [0], [1], [0, 0, 1, 1], [], []>} : vector<128x9xbf16>, vector<9x16xbf16>, vector<128x16xf32> -> vector<128x16xf32>
    %c0_3 = arith.constant 0 : index
    %c0_4 = arith.constant 0 : index
    %3 = vector.load %arg2[%c0_3, %c0_4] : memref<1x16xf32, #tpu.memory_space<vmem>>, vector<1x16xf32>
    %4 = vector.broadcast %3 : vector<1x16xf32> to vector<128x16xf32>
    %5 = arith.addf %2, %4 : vector<128x16xf32>
    %c0_5 = arith.constant 0 : index
    %c0_6 = arith.constant 0 : index
    %6 = vector.load %arg3[%c0_5, %c0_6] : memref<1x16xf32, #tpu.memory_space<vmem>>, vector<1x16xf32>
    %c0_7 = arith.constant 0 : index
    %c0_8 = arith.constant 0 : index
    %7 = vector.load %arg4[%c0_7, %c0_8] : memref<1x16xf32, #tpu.memory_space<vmem>>, vector<1x16xf32>
    %cst_9 = arith.constant dense<0.000000e+00> : vector<16xf32>
    %8 = vector.multi_reduction <add>, %5, %cst_9 [0] : vector<128x16xf32> to vector<16xf32>
    %9 = vector.shape_cast %8 : vector<16xf32> to vector<1x16xf32>
    %cst_10 = arith.constant 7.812500e-03 : f32
    %10 = vector.broadcast %cst_10 : f32 to vector<1x16xf32>
    %11 = arith.mulf %9, %10 : vector<1x16xf32>
    %12 = vector.broadcast %11 : vector<1x16xf32> to vector<128x16xf32>
    %13 = arith.subf %5, %12 : vector<128x16xf32>
    %14 = arith.mulf %13, %13 : vector<128x16xf32>
    %cst_11 = arith.constant dense<0.000000e+00> : vector<16xf32>
    %15 = vector.multi_reduction <add>, %14, %cst_11 [0] : vector<128x16xf32> to vector<16xf32>
    %16 = vector.shape_cast %15 : vector<16xf32> to vector<1x16xf32>
    %cst_12 = arith.constant 7.812500e-03 : f32
    %17 = vector.broadcast %cst_12 : f32 to vector<1x16xf32>
    %18 = arith.mulf %16, %17 : vector<1x16xf32>
    %cst_13 = arith.constant 9.99999974E-6 : f32
    %19 = vector.broadcast %cst_13 : f32 to vector<1x16xf32>
    %20 = arith.addf %18, %19 : vector<1x16xf32>
    %21 = math.rsqrt %20 : vector<1x16xf32>
    %22 = arith.mulf %21, %6 : vector<1x16xf32>
    %23 = vector.broadcast %22 : vector<1x16xf32> to vector<128x16xf32>
    %24 = arith.mulf %13, %23 : vector<128x16xf32>
    %25 = vector.broadcast %7 : vector<1x16xf32> to vector<128x16xf32>
    %26 = arith.addf %24, %25 : vector<128x16xf32>
    %cst_14 = arith.constant 0.000000e+00 : f32
    %27 = vector.broadcast %cst_14 : f32 to vector<128x16xf32>
    %28 = arith.maximumf %26, %27 : vector<128x16xf32>
    %29 = arith.truncf %28 : vector<128x16xf32> to vector<128x16xbf16>
    %c0_15 = arith.constant 0 : index
    %c0_16 = arith.constant 0 : index
    %30 = vector.load %arg5[%c0_15, %c0_16] : memref<144x64xbf16, #tpu.memory_space<vmem>>, vector<144x64xbf16>
    %31 = vector.extract_strided_slice %29 {offsets = [0, 0], sizes = [64, 16], strides = [1, 1]} : vector<128x16xbf16> to vector<64x16xbf16>
    %cst_17 = arith.constant dense<0.000000e+00> : vector<144x16xf32>
    %32 = tpu.matmul %30, %31, %cst_17 {dimension_numbers = #tpu.dot_dimension_numbers<[1], [0], [0], [1], [0, 0, 1, 1], [], []>} : vector<144x64xbf16>, vector<64x16xbf16>, vector<144x16xf32> -> vector<144x16xf32>
    %33 = vector.extract_strided_slice %32 {offsets = [0, 0], sizes = [16, 16], strides = [1, 1]} : vector<144x16xf32> to vector<16x16xf32>
    %34 = vector.extract_strided_slice %32 {offsets = [16, 0], sizes = [16, 16], strides = [1, 1]} : vector<144x16xf32> to vector<16x16xf32>
    %35 = vector.extract_strided_slice %32 {offsets = [32, 0], sizes = [16, 16], strides = [1, 1]} : vector<144x16xf32> to vector<16x16xf32>
    %36 = vector.extract_strided_slice %32 {offsets = [48, 0], sizes = [16, 16], strides = [1, 1]} : vector<144x16xf32> to vector<16x16xf32>
    %37 = vector.extract_strided_slice %32 {offsets = [64, 0], sizes = [16, 16], strides = [1, 1]} : vector<144x16xf32> to vector<16x16xf32>
    %38 = vector.extract_strided_slice %32 {offsets = [80, 0], sizes = [16, 16], strides = [1, 1]} : vector<144x16xf32> to vector<16x16xf32>
    %39 = vector.extract_strided_slice %32 {offsets = [96, 0], sizes = [16, 16], strides = [1, 1]} : vector<144x16xf32> to vector<16x16xf32>
    %40 = vector.extract_strided_slice %32 {offsets = [112, 0], sizes = [16, 16], strides = [1, 1]} : vector<144x16xf32> to vector<16x16xf32>
    %41 = vector.extract_strided_slice %32 {offsets = [128, 0], sizes = [16, 16], strides = [1, 1]} : vector<144x16xf32> to vector<16x16xf32>
    %42 = tpu.concatenate %33, %34, %35, %36, %37, %38, %39, %40, %41 in 1 : vector<16x16xf32>, vector<16x16xf32>, vector<16x16xf32>, vector<16x16xf32>, vector<16x16xf32>, vector<16x16xf32>, vector<16x16xf32>, vector<16x16xf32>, vector<16x16xf32> -> vector<16x144xf32>
    %43 = vector.extract_strided_slice %29 {offsets = [64, 0], sizes = [64, 16], strides = [1, 1]} : vector<128x16xbf16> to vector<64x16xbf16>
    %cst_18 = arith.constant dense<0.000000e+00> : vector<144x16xf32>
    %44 = tpu.matmul %30, %43, %cst_18 {dimension_numbers = #tpu.dot_dimension_numbers<[1], [0], [0], [1], [0, 0, 1, 1], [], []>} : vector<144x64xbf16>, vector<64x16xbf16>, vector<144x16xf32> -> vector<144x16xf32>
    %45 = vector.extract_strided_slice %44 {offsets = [0, 0], sizes = [16, 16], strides = [1, 1]} : vector<144x16xf32> to vector<16x16xf32>
    %46 = vector.extract_strided_slice %44 {offsets = [16, 0], sizes = [16, 16], strides = [1, 1]} : vector<144x16xf32> to vector<16x16xf32>
    %47 = vector.extract_strided_slice %44 {offsets = [32, 0], sizes = [16, 16], strides = [1, 1]} : vector<144x16xf32> to vector<16x16xf32>
    %48 = vector.extract_strided_slice %44 {offsets = [48, 0], sizes = [16, 16], strides = [1, 1]} : vector<144x16xf32> to vector<16x16xf32>
    %49 = vector.extract_strided_slice %44 {offsets = [64, 0], sizes = [16, 16], strides = [1, 1]} : vector<144x16xf32> to vector<16x16xf32>
    %50 = vector.extract_strided_slice %44 {offsets = [80, 0], sizes = [16, 16], strides = [1, 1]} : vector<144x16xf32> to vector<16x16xf32>
    %51 = vector.extract_strided_slice %44 {offsets = [96, 0], sizes = [16, 16], strides = [1, 1]} : vector<144x16xf32> to vector<16x16xf32>
    %52 = vector.extract_strided_slice %44 {offsets = [112, 0], sizes = [16, 16], strides = [1, 1]} : vector<144x16xf32> to vector<16x16xf32>
    %53 = vector.extract_strided_slice %44 {offsets = [128, 0], sizes = [16, 16], strides = [1, 1]} : vector<144x16xf32> to vector<16x16xf32>
    %54 = tpu.concatenate %45, %46, %47, %48, %49, %50, %51, %52, %53 in 1 : vector<16x16xf32>, vector<16x16xf32>, vector<16x16xf32>, vector<16x16xf32>, vector<16x16xf32>, vector<16x16xf32>, vector<16x16xf32>, vector<16x16xf32>, vector<16x16xf32> -> vector<16x144xf32>
    %55 = tpu.concatenate %42, %54 in 0 : vector<16x144xf32>, vector<16x144xf32> -> vector<32x144xf32>
    %56 = arith.truncf %55 : vector<32x144xf32> to vector<32x144xbf16>
    %c0_19 = arith.constant 0 : index
    %c0_20 = arith.constant 0 : index
    %57 = vector.load %arg6[%c0_19, %c0_20] : memref<144x32xbf16, #tpu.memory_space<vmem>>, vector<144x32xbf16>
    %cst_21 = arith.constant dense<0.000000e+00> : vector<32x32xf32>
    %58 = tpu.matmul %56, %57, %cst_21 {dimension_numbers = #tpu.dot_dimension_numbers<[1], [0], [0], [1], [0, 0, 1, 1], [], []>} : vector<32x144xbf16>, vector<144x32xbf16>, vector<32x32xf32> -> vector<32x32xf32>
    %c0_22 = arith.constant 0 : index
    %c0_23 = arith.constant 0 : index
    %59 = vector.load %arg7[%c0_22, %c0_23] : memref<1x32xf32, #tpu.memory_space<vmem>>, vector<1x32xf32>
    %60 = vector.broadcast %59 : vector<1x32xf32> to vector<32x32xf32>
    %61 = arith.addf %58, %60 : vector<32x32xf32>
    %c0_24 = arith.constant 0 : index
    %c0_25 = arith.constant 0 : index
    %62 = vector.load %arg8[%c0_24, %c0_25] : memref<1x32xf32, #tpu.memory_space<vmem>>, vector<1x32xf32>
    %c0_26 = arith.constant 0 : index
    %c0_27 = arith.constant 0 : index
    %63 = vector.load %arg9[%c0_26, %c0_27] : memref<1x32xf32, #tpu.memory_space<vmem>>, vector<1x32xf32>
    %cst_28 = arith.constant dense<0.000000e+00> : vector<32xf32>
    %64 = vector.multi_reduction <add>, %61, %cst_28 [0] : vector<32x32xf32> to vector<32xf32>
    %65 = vector.shape_cast %64 : vector<32xf32> to vector<1x32xf32>
    %cst_29 = arith.constant 3.125000e-02 : f32
    %66 = vector.broadcast %cst_29 : f32 to vector<1x32xf32>
    %67 = arith.mulf %65, %66 : vector<1x32xf32>
    %68 = vector.broadcast %67 : vector<1x32xf32> to vector<32x32xf32>
    %69 = arith.subf %61, %68 : vector<32x32xf32>
    %70 = arith.mulf %69, %69 : vector<32x32xf32>
    %cst_30 = arith.constant dense<0.000000e+00> : vector<32xf32>
    %71 = vector.multi_reduction <add>, %70, %cst_30 [0] : vector<32x32xf32> to vector<32xf32>
    %72 = vector.shape_cast %71 : vector<32xf32> to vector<1x32xf32>
    %cst_31 = arith.constant 3.125000e-02 : f32
    %73 = vector.broadcast %cst_31 : f32 to vector<1x32xf32>
    %74 = arith.mulf %72, %73 : vector<1x32xf32>
    %cst_32 = arith.constant 9.99999974E-6 : f32
    %75 = vector.broadcast %cst_32 : f32 to vector<1x32xf32>
    %76 = arith.addf %74, %75 : vector<1x32xf32>
    %77 = math.rsqrt %76 : vector<1x32xf32>
    %78 = arith.mulf %77, %62 : vector<1x32xf32>
    %79 = vector.broadcast %78 : vector<1x32xf32> to vector<32x32xf32>
    %80 = arith.mulf %69, %79 : vector<32x32xf32>
    %81 = vector.broadcast %63 : vector<1x32xf32> to vector<32x32xf32>
    %82 = arith.addf %80, %81 : vector<32x32xf32>
    %cst_33 = arith.constant 0.000000e+00 : f32
    %83 = vector.broadcast %cst_33 : f32 to vector<32x32xf32>
    %84 = arith.maximumf %82, %83 : vector<32x32xf32>
    %c0_34 = arith.constant 0 : index
    %c0_35 = arith.constant 0 : index
    %85 = vector.load %arg10[%c0_34, %c0_35] : memref<16x32xf32, #tpu.memory_space<vmem>>, vector<16x32xf32>
    %86 = vector.extract_strided_slice %84 {offsets = [0, 0], sizes = [16, 32], strides = [1, 1]} : vector<32x32xf32> to vector<16x32xf32>
    %87 = arith.mulf %86, %85 : vector<16x32xf32>
    %cst_36 = arith.constant dense<0.000000e+00> : vector<16xf32>
    %88 = vector.multi_reduction <add>, %87, %cst_36 [1] : vector<16x32xf32> to vector<16xf32>
    %89 = vector.shape_cast %88 : vector<16xf32> to vector<16x1xf32>
    %cst_37 = arith.constant dense<0.000000e+00> : vector<1xf32>
    %90 = vector.multi_reduction <add>, %89, %cst_37 [0] : vector<16x1xf32> to vector<1xf32>
    %91 = vector.shape_cast %90 : vector<1xf32> to vector<1x1xf32>
    %92 = vector.extract_strided_slice %84 {offsets = [16, 0], sizes = [16, 32], strides = [1, 1]} : vector<32x32xf32> to vector<16x32xf32>
    %93 = arith.mulf %92, %85 : vector<16x32xf32>
    %cst_38 = arith.constant dense<0.000000e+00> : vector<16xf32>
    %94 = vector.multi_reduction <add>, %93, %cst_38 [1] : vector<16x32xf32> to vector<16xf32>
    %95 = vector.shape_cast %94 : vector<16xf32> to vector<16x1xf32>
    %cst_39 = arith.constant dense<0.000000e+00> : vector<1xf32>
    %96 = vector.multi_reduction <add>, %95, %cst_39 [0] : vector<16x1xf32> to vector<1xf32>
    %97 = vector.shape_cast %96 : vector<1xf32> to vector<1x1xf32>
    %98 = tpu.concatenate %91, %97 in 0 : vector<1x1xf32>, vector<1x1xf32> -> vector<2x1xf32>
    %c0_40 = arith.constant 0 : index
    %c0_41 = arith.constant 0 : index
    %99 = vector.load %arg11[%c0_40, %c0_41] : memref<1x1xf32, #tpu.memory_space<vmem>>, vector<1x1xf32>
    %100 = vector.broadcast %99 : vector<1x1xf32> to vector<2x1xf32>
    %101 = arith.addf %98, %100 : vector<2x1xf32>
    %cst_42 = arith.constant 0.000000e+00 : f32
    %102 = vector.broadcast %cst_42 : f32 to vector<2x1xf32>
    %103 = arith.subf %102, %101 : vector<2x1xf32>
    %104 = math.exp %103 : vector<2x1xf32>
    %cst_43 = arith.constant 1.000000e+00 : f32
    %105 = vector.broadcast %cst_43 : f32 to vector<2x1xf32>
    %106 = arith.addf %105, %104 : vector<2x1xf32>
    %cst_44 = arith.constant 1.000000e+00 : f32
    %107 = vector.broadcast %cst_44 : f32 to vector<2x1xf32>
    %108 = arith.divf %107, %106 : vector<2x1xf32>
    %c0_45 = arith.constant 0 : index
    %c0_46 = arith.constant 0 : index
    %109 = vector.load %arg12[%c0_45, %c0_46] : memref<2x1xf32, #tpu.memory_space<vmem>>, vector<2x1xf32>
    tpu.vector_store %arg12[%c0_45, %c0_46], %108 {strides = array<i32>} : memref<2x1xf32, #tpu.memory_space<vmem>>, vector<2x1xf32>,
    return
  }
}

</mosaic_0001>

<bundles_post_ra>
// kernel: discriminator_forward.1
= control target key start
LH: loop header
LB: loop body
LE: loop exit
PB: predicated region body
PF: predicated region fallthrough
CT: control target
= control target key end

     0   :  { %vm139_vm0 = vcmask 1043456   ;;  %vm140_vm1 = vcmask 1044480   ;;  %vm114_vm2 = vcmask 72704   ;;  %v1441_v1 = vmov 65535   ;;  %s1446_s27 = smov 32   ;;  %s1447_s29 = smov 48   ;;  %s1909_s1 = inlined_call_operand.vmem [shape: bf16[9,16], index: 1, kind: input, shape index: {}]   ;;  %s1910_s0 = inlined_call_operand.vmem [shape: bf16[128,9], index: 0, kind: input, shape index: {}]   ;;  %s1911_s2 = inlined_call_operand.vmem [shape: f32[1,16], index: 2, kind: input, shape index: {}]   ;;  %s1912_s5 = inlined_call_operand.vmem [shape: bf16[144,64], index: 5, kind: input, shape index: {}]   ;;  %s1913_s3 = inlined_call_operand.vmem [shape: f32[1,16], index: 3, kind: input, shape index: {}]   ;;  %s1914_s4 = inlined_call_operand.vmem [shape: f32[1,16], index: 4, kind: input, shape index: {}]   ;;  %s1915_s6 = inlined_call_operand.vmem [shape: bf16[144,32], index: 6, kind: input, shape index: {}]   ;;  %s1916_s7 = inlined_call_operand.vmem [shape: f32[1,32], index: 7, kind: input, shape index: {}]   ;;  %s1917_s8 = inlined_call_operand.vmem [shape: f32[1,32], index: 8, kind: input, shape index: {}]   ;;  %s1918_s9 = inlined_call_operand.vmem [shape: f32[1,32], index: 9, kind: input, shape index: {}]   ;;  %s1919_s10 = inlined_call_operand.vmem [shape: f32[16,32], index: 10, kind: input, shape index: {}]   ;;  %s1920_s11 = inlined_call_operand.<no memory space> [shape: f32[1,1], index: 11, kind: input, shape index: {}]   ;;  %s1921_s12 = inlined_call_operand.vmem [shape: f32[2,1], index: 12, kind: output, shape index: {}]  }
   0x1   :  { %v1406_v0 = vld [vmem:[%s1909_s1] sm:$0x1f]   ;;  %v141_v2 = vsel %vm139_vm0, 4294967295, %v1441_v1  ;;  %v1408_v6 = vld [vmem:[%s1910_s0 + $0x8] sm:$0xff]   ;;  %v1409_v7 = vld [vmem:[%s1910_s0 + $0x10] sm:$0xff]   ;;  %v1442_v13 = vmov 0.0  }
   0x2   :  { %v1407_v3 = vld [vmem:[%s1910_s0] sm:$0xff]   ;;  %v142_v4 = vsel %vm140_vm1, %v141_v2, 0  ;;  %v1410_v8 = vld [vmem:[%s1910_s0 + $0x18] sm:$0xff]   ;;  %v1412_v10 = vld [vmem:[%s1910_s0 + $0x28] sm:$0xff]   ;;  %1237 = vmatprep.subr.bf16.mxu1 %v1442_v13  ;;  %vm245_vm3 = vcmask 130048   ;;  %vm1443_vm4 = vmmov 0  }
   0x3   :  { %v144_v5 = vand.u32 %v1406_v0, %v142_v4  ;;  %1221 = vmatprep.mubr.msk.bf16.mxu0 %vm114_vm2, %v1407_v3  ;;  %v1411_v9 = vld [vmem:[%s1910_s0 + $0x20] sm:$0xff]   ;;  %v1413_v11 = vld [vmem:[%s1910_s0 + $0x30] sm:$0xff]   ;;  %v1414_v12 = vld [vmem:[%s1910_s0 + $0x38] sm:$0xff]   ;;  %1245 = vmatprep.mubr.msk.bf16.mxu1 %vm1443_vm4, %v1442_v13  ;;  %vm486_vm5 = vcmask 523264   ;;  %s1448_s14 = smov 64   ;;  %s1449_s15 = smov 80  }
   0x4   :  { %v1124_v14 = vld [vmem:[%s1911_s2] ss:$0 sm:$0xff]  ;;  %s1450_s20 = smov 96   ;;  %s1451_s21 = smov 112   ;;  %vm677_vm6 = vcmask 261120   ;;  %vm680_vm7 = vcmask 392192  }
   0x5   :  { %1219 = vmatprep.subr.bf16.mxu0 %v144_v5  ;;  %vm685_vm8 = vcmask 654336   ;;  %vm688_vm9 = vcmask 785408   ;;  %vm691_vm10 = vcmask 916480   ;;  %vm1102_vm11 = vcmask 1040384  }
   0x6   :  { %1220 = vmatpush3.bf16.msra.mxu0 %v144_v5  ;;  %vm1118_vm12 = vcmask 1024  }
   0x7   :  { %1281 = vmatprep.subr.bf16.mxu0 %v1442_v13 }
   0x9   :  { %1222 = vmatmul.mubr.msk.bf16.vlgmr.msra.gmra.mrb[0].mxu0 %vm114_vm2, %v1408_v6 }
   0xa   :  { %1225 = vmatprep.mubr.msk.bf16.mxu0 %vm114_vm2, %v1409_v7 }
  0x11   :  { %1226 = vmatmul.mubr.msk.bf16.gmra.mrb[4].mxu0 %vm114_vm2, %v1410_v8 }
  0x12   :  { %1229 = vmatprep.mubr.msk.bf16.mxu0 %vm114_vm2, %v1411_v9 }
  0x19   :  { %1230 = vmatmul.mubr.msk.bf16.gmra.mrb[8].mxu0 %vm114_vm2, %v1412_v10 }
  0x1a   :  { %1233 = vmatprep.mubr.msk.bf16.mxu0 %vm114_vm2, %v1413_v11 }
  0x21   :  { %1234 = vmatmul.mubr.msk.bf16.gmra.mrb[12].mxu0 %vm114_vm2, %v1414_v12 }
  0x22   :  { %1289 = vmatprep.mubr.msk.bf16.mxu0 %vm1443_vm4, %v1442_v13 }
  0xdc   :  { %v1223_v15 = vpop.f32.mrb[0].mxu0 }
  0xdd   :  { %v180_v16 = vpop.f32.mrb[1].mxu0  ;;  %v1559_v20 = vadd.f32 %v1223_v15, %v1124_v14 }
  0xde   :  { %v1557_v17 = vadd.f32 %v1124_v14, %v180_v16  ;;  %v1224_v18 = vpop.f32.mrb[2].mxu0 }
  0xdf   :  { %v183_v19 = vpop.f32.mrb[3].mxu0  ;;  %v1565_v23 = vadd.f32 %v1224_v18, %v1124_v14  ;;  %v249_v26 = vsel %vm245_vm3, %v1559_v20, 0.0 }
  0xe0   :  { %v1561_v21 = vadd.f32 %v1124_v14, %v183_v19  ;;  %v246_v22 = vsel %vm245_vm3, %v1557_v17, 0.0 }
  0xe1   :  { %v251_v30 = vsel %vm245_vm3, %v1565_v23, 0.0 }
  0xe2   :  { %v247_v24 = vsel %vm245_vm3, %v1561_v21, 0.0 }
  0xe3   :  { %v248_v25 = vadd.f32 %v247_v24, %v246_v22 }
  0xe4   :  { %v1227_v27 = vpop.f32.mrb[4].mxu0 }
  0xe5   :  { %v250_v28 = vadd.f32 %v249_v26, %v248_v25  ;;  %v196_v29 = vpop.f32.mrb[5].mxu0  ;;  %v205_v35 = vadd.f32 %v1227_v27, %v1124_v14 }
  0xe6   :  { %v197_v31 = vadd.f32 %v1124_v14, %v196_v29  ;;  %v1228_v32 = vpop.f32.mrb[6].mxu0 }
  0xe7   :  { %v252_v33 = vadd.f32 %v251_v30, %v250_v28  ;;  %v199_v34 = vpop.f32.mrb[7].mxu0  ;;  %v208_v39 = vadd.f32 %v1228_v32, %v1124_v14  ;;  %v257_v42 = vsel %vm245_vm3, %v205_v35, 0.0 }
  0xe8   :  { %v253_v36 = vsel %vm245_vm3, %v197_v31, 0.0  ;;  %v200_v37 = vadd.f32 %v1124_v14, %v199_v34 }
  0xe9   :  { %v254_v38 = vadd.f32 %v253_v36, %v252_v33  ;;  %v259_v46 = vsel %vm245_vm3, %v208_v39, 0.0 }
  0xea   :  { %v255_v40 = vsel %vm245_vm3, %v200_v37, 0.0 }
  0xeb   :  { %v256_v41 = vadd.f32 %v255_v40, %v254_v38 }
  0xec   :  { %v1231_v43 = vpop.f32.mrb[8].mxu0 }
  0xed   :  { %v258_v44 = vadd.f32 %v257_v42, %v256_v41  ;;  %v212_v45 = vpop.f32.mrb[9].mxu0  ;;  %v221_v51 = vadd.f32 %v1231_v43, %v1124_v14 }
  0xee   :  { %v213_v47 = vadd.f32 %v1124_v14, %v212_v45  ;;  %v1232_v48 = vpop.f32.mrb[10].mxu0 }
  0xef   :  { %v260_v49 = vadd.f32 %v259_v46, %v258_v44  ;;  %v215_v50 = vpop.f32.mrb[11].mxu0  ;;  %v224_v55 = vadd.f32 %v1232_v48, %v1124_v14  ;;  %v265_v58 = vsel %vm245_vm3, %v221_v51, 0.0 }
  0xf0   :  { %v261_v52 = vsel %vm245_vm3, %v213_v47, 0.0  ;;  %v216_v53 = vadd.f32 %v1124_v14, %v215_v50 }
  0xf1   :  { %v262_v54 = vadd.f32 %v261_v52, %v260_v49  ;;  %v267_v62 = vsel %vm245_vm3, %v224_v55, 0.0 }
  0xf2   :  { %v263_v56 = vsel %vm245_vm3, %v216_v53, 0.0 }
  0xf3   :  { %v264_v57 = vadd.f32 %v263_v56, %v262_v54 }
  0xf4   :  { %v1235_v59 = vpop.f32.mrb[12].mxu0 }
  0xf5   :  { %v266_v60 = vadd.f32 %v265_v58, %v264_v57  ;;  %v228_v61 = vpop.f32.mrb[13].mxu0  ;;  %v237_v3 = vadd.f32 %v1235_v59, %v1124_v14 }
  0xf6   :  { %v229_v63 = vadd.f32 %v1124_v14, %v228_v61  ;;  %v1236_v0 = vpop.f32.mrb[14].mxu0 }
  0xf7   :  { %v268_v1 = vadd.f32 %v267_v62, %v266_v60  ;;  %v231_v2 = vpop.f32.mrb[15].mxu0  ;;  %v240_v7 = vadd.f32 %v1236_v0, %v1124_v14  ;;  %v273_v10 = vsel %vm245_vm3, %v237_v3, 0.0 }
  0xf8   :  { %v269_v4 = vsel %vm245_vm3, %v229_v63, 0.0  ;;  %v232_v5 = vadd.f32 %v1124_v14, %v231_v2 }
  0xf9   :  { %v270_v6 = vadd.f32 %v269_v4, %v268_v1  ;;  %v275_v12 = vsel %vm245_vm3, %v240_v7, 0.0 }
  0xfa   :  { %v271_v8 = vsel %vm245_vm3, %v232_v5, 0.0 }
  0xfb   :  { %v272_v9 = vadd.f32 %v271_v8, %v270_v6 }
  0xfd   :  { %v274_v11 = vadd.f32 %v273_v10, %v272_v9 }
  0xff   :  { %v276_v15 = vadd.f32 %v275_v12, %v274_v11 }
 0x101   :  { %v277_v16 = vrot.slane %v276_v15, 4 }
 0x103   :  { %v278_v18 = vadd.f32 %v277_v16, %v276_v15 }
 0x105   :  { %v279_v19 = vrot.slane %v278_v18, 2 }
 0x107   :  { %v280_v22 = vadd.f32 %v279_v19, %v278_v18 }
 0x109   :  { %v281_v24 = vrot.slane %v280_v22, 1 }
 0x10b   :  { %v282_v25 = vadd.f32 %v281_v24, %v280_v22 }
 0x10d   :  { %v283_v26 = vmul.f32 0.0078125, %v282_v25 }
 0x10f   :  { %v1590_v27 = vsub.f32 %v1557_v17, %v283_v26  ;;  %v1593_v14 = vsub.f32 %v1561_v21, %v283_v26  ;;  %v1596_v28 = vsub.f32 %v1559_v20, %v283_v26  ;;  %v1599_v29 = vsub.f32 %v1565_v23, %v283_v26 }
 0x110   :  { %v1601_v30 = vsub.f32 %v197_v31, %v283_v26  ;;  %v1603_v32 = vsub.f32 %v200_v37, %v283_v26  ;;  %v1605_v33 = vsub.f32 %v205_v35, %v283_v26  ;;  %v1607_v34 = vsub.f32 %v208_v39, %v283_v26 }
 0x111   :  { %v1609_v36 = vsub.f32 %v213_v47, %v283_v26  ;;  %v1611_v17 = vsub.f32 %v216_v53, %v283_v26  ;;  %v1613_v21 = vsub.f32 %v221_v51, %v283_v26  ;;  %v1615_v38 = vsub.f32 %v224_v55, %v283_v26 }
 0x112   :  { %v1617_v20 = vsub.f32 %v229_v63, %v283_v26  ;;  %v1619_v23 = vsub.f32 %v232_v5, %v283_v26  ;;  %v1621_v31 = vsub.f32 %v237_v3, %v283_v26  ;;  %v1623_v37 = vsub.f32 %v240_v7, %v283_v26 }
 0x113   :  { %v300_v35 = vmul.f32 %v1590_v27, %v1590_v27  ;;  %v301_v39 = vmul.f32 %v1593_v14, %v1593_v14  ;;  %v302_v40 = vmul.f32 %v1596_v28, %v1596_v28  ;;  %v303_v41 = vmul.f32 %v1599_v29, %v1599_v29 }
 0x114   :  { %v304_v45 = vmul.f32 %v1601_v30, %v1601_v30  ;;  %v305_v48 = vmul.f32 %v1603_v32, %v1603_v32  ;;  %v306_v51 = vmul.f32 %v1605_v33, %v1605_v33  ;;  %v307_v54 = vmul.f32 %v1607_v34, %v1607_v34 }
 0x115   :  { %v316_v42 = vsel %vm245_vm3, %v300_v35, 0.0  ;;  %v317_v43 = vsel %vm245_vm3, %v301_v39, 0.0  ;;  %v319_v46 = vsel %vm245_vm3, %v302_v40, 0.0  ;;  %v321_v49 = vsel %vm245_vm3, %v303_v41, 0.0 }
 0x116   :  { %v318_v44 = vadd.f32 %v317_v43, %v316_v42  ;;  %v323_v52 = vsel %vm245_vm3, %v304_v45, 0.0  ;;  %v325_v55 = vsel %vm245_vm3, %v305_v48, 0.0  ;;  %v308_v57 = vmul.f32 %v1609_v36, %v1609_v36  ;;  %v243_v48 = vld [vmem:[%s1913_s3] sm:$0x1]  ;;  %s1445_s3 = smov 16  }
 0x117   :  { %v327_v58 = vsel %vm245_vm3, %v306_v51, 0.0  ;;  %v309_v60 = vmul.f32 %v1611_v17, %v1611_v17  ;;  %v329_v61 = vsel %vm245_vm3, %v307_v54, 0.0  ;;  %v310_v63 = vmul.f32 %v1613_v21, %v1613_v21 }
 0x118   :  { %v320_v47 = vadd.f32 %v319_v46, %v318_v44  ;;  %v331_v0 = vsel %vm245_vm3, %v308_v57, 0.0  ;;  %v311_v2 = vmul.f32 %v1615_v38, %v1615_v38  ;;  %v312_v5 = vmul.f32 %v1617_v20, %v1617_v20 }
 0x119   :  { %v333_v3 = vsel %vm245_vm3, %v309_v60, 0.0  ;;  %v335_v6 = vsel %vm245_vm3, %v310_v63, 0.0  ;;  %v313_v8 = vmul.f32 %v1619_v23, %v1619_v23  ;;  %v314_v11 = vmul.f32 %v1621_v31, %v1621_v31 }
 0x11a   :  { %v322_v50 = vadd.f32 %v321_v49, %v320_v47  ;;  %v337_v9 = vsel %vm245_vm3, %v311_v2, 0.0  ;;  %v339_v12 = vsel %vm245_vm3, %v312_v5, 0.0  ;;  %v315_v16 = vmul.f32 %v1623_v37, %v1623_v37 }
 0x11b   :  { %v341_v18 = vsel %vm245_vm3, %v313_v8, 0.0  ;;  %v343_v22 = vsel %vm245_vm3, %v314_v11, 0.0  ;;  %v357_v46 = vlaneseq }
 0x11c   :  { %v324_v53 = vadd.f32 %v323_v52, %v322_v50  ;;  %v345_v25 = vsel %vm245_vm3, %v315_v16, 0.0 }
 0x11d   :  { %v1673_v47 = vshrl.u32 %v357_v46, 7 }
 0x11e   :  { %v326_v56 = vadd.f32 %v325_v55, %v324_v53  ;;  %v1142_v53 = vld [vmem:[%s1914_s4] ss:$0 sm:$0xff] }
 0x11f   :  { %v359_v49 = vsub.s32 0, %v1673_v47  ;;  %v1070_v47 = vld [vmem:[%s1919_s10] sm:$0xff] }
 0x120   :  { %v328_v59 = vadd.f32 %v327_v58, %v326_v56 }
 0x122   :  { %v330_v62 = vadd.f32 %v329_v61, %v328_v59 }
 0x124   :  { %v332_v1 = vadd.f32 %v331_v0, %v330_v62 }
 0x126   :  { %v334_v4 = vadd.f32 %v333_v3, %v332_v1 }
 0x128   :  { %v336_v7 = vadd.f32 %v335_v6, %v334_v4 }
 0x12a   :  { %v338_v10 = vadd.f32 %v337_v9, %v336_v7 }
 0x12c   :  { %v340_v15 = vadd.f32 %v339_v12, %v338_v10 }
 0x12e   :  { %v342_v19 = vadd.f32 %v341_v18, %v340_v15 }
 0x130   :  { %v344_v24 = vadd.f32 %v343_v22, %v342_v19 }
 0x132   :  { %v346_v26 = vadd.f32 %v345_v25, %v344_v24 }
 0x134   :  { %v347_v35 = vrot.slane %v346_v26, 4 }
 0x136   :  { %v348_v39 = vadd.f32 %v347_v35, %v346_v26 }
 0x138   :  { %v349_v40 = vrot.slane %v348_v39, 2 }
 0x13a   :  { %v350_v41 = vadd.f32 %v349_v40, %v348_v39 }
 0x13c   :  { %v351_v42 = vrot.slane %v350_v41, 1 }
 0x13e   :  { %v352_v43 = vadd.f32 %v351_v42, %v350_v41 }
 0x140   :  { %v353_v44 = vmul.f32 0.0078125, %v352_v43 }
 0x142   :  { %v354_v45 = vadd.f32 1e-05, %v353_v44 }
 0x144   :  { %1433 = vrsqrt.f32 %v354_v45 }
 0x14e   :  { %v1434_v50 = vpop.eup %1433 }
 0x14f   :  { %v356_v51 = vmul.f32 %v1434_v50, %v243_v48  ;;  %v1415_v48 = vld [vmem:[%s1912_s5] sm:$0xff]   ;;  %v1416_v50 = vld [vmem:[%s1912_s5 + $0x8] sm:$0xff]  }
 0x151   :  { %v360_v52 = vrot.slane %v356_v51, %v359_v49  ;;  %v1417_v51 = vld [vmem:[%s1912_s5 + $0x10] sm:$0xff]  }
 0x153   :  { %v374_v54 = vmul.f32 %v360_v52, %v1619_v23  ;;  %v361_v55 = vmul.f32 %v360_v52, %v1590_v27  ;;  %v362_v56 = vmul.f32 %v360_v52, %v1593_v14  ;;  %v369_v57 = vmul.f32 %v360_v52, %v1609_v36 }
 0x154   :  { %v370_v58 = vmul.f32 %v360_v52, %v1611_v17  ;;  %v363_v59 = vmul.f32 %v360_v52, %v1596_v28  ;;  %v364_v60 = vmul.f32 %v360_v52, %v1599_v29  ;;  %v371_v61 = vmul.f32 %v360_v52, %v1613_v21 }
 0x155   :  { %v383_v62 = vadd.f32 %v1142_v53, %v361_v55  ;;  %v384_v63 = vadd.f32 %v1142_v53, %v362_v56  ;;  %v391_v0 = vadd.f32 %v1142_v53, %v369_v57  ;;  %v372_v27 = vmul.f32 %v360_v52, %v1615_v38  ;;  %v1421_v55 = vld [vmem:[%s1912_s5 + $0x30] sm:$0xff]   ;;  %v1422_v56 = vld [vmem:[%s1912_s5 + $0x38] sm:$0xff]   ;;  %v1423_v57 = vld [vmem:[%s1912_s5 + $0x40] sm:$0xff]  }
 0x156   :  { %v392_v1 = vadd.f32 %v1142_v53, %v370_v58  ;;  %v385_v2 = vadd.f32 %v1142_v53, %v363_v59  ;;  %v386_v23 = vadd.f32 %v1142_v53, %v364_v60  ;;  %v396_v3 = vadd.f32 %v1142_v53, %v374_v54  ;;  %v1420_v54 = vld [vmem:[%s1912_s5 + $0x28] sm:$0xff]   ;;  %v1424_v59 = vld [vmem:[%s1915_s6] sm:$0xff]  }
 0x157   :  { %v399_v14 = vmax.f32 %v383_v62, 0.0  ;;  %v400_v4 = vmax.f32 %v384_v63, 0.0  ;;  %v407_v36 = vmax.f32 %v391_v0, 0.0  ;;  %v393_v28 = vadd.f32 %v1142_v53, %v371_v61  ;;  %v1425_v60 = vld [vmem:[%s1915_s6 + $0x8] sm:$0xff]  }
 0x158   :  { %v408_v5 = vmax.f32 %v392_v1, 0.0  ;;  %v401_v17 = vmax.f32 %v385_v2, 0.0  ;;  %v402_v6 = vmax.f32 %v386_v23, 0.0  ;;  %v394_v29 = vadd.f32 %v1142_v53, %v372_v27  ;;  %v1426_v23 = vld [vmem:[%s1915_s6 + $0x10] sm:$0xff]  }
 0x159   :  { %v415_v7 = vpack.c.bf16 %v400_v4, %v399_v14  ;;  %v365_v21 = vmul.f32 %v360_v52, %v1601_v30  ;;  %v366_v8 = vmul.f32 %v360_v52, %v1603_v32  ;;  %v409_v11 = vmax.f32 %v393_v28, 0.0 }
 0x15a   :  { %v419_v9 = vpack.c.bf16 %v408_v5, %v407_v36  ;;  %v416_v10 = vpack.c.bf16 %v402_v6, %v401_v17  ;;  %v373_v12 = vmul.f32 %v360_v52, %v1617_v20  ;;  %v410_v38 = vmax.f32 %v394_v29, 0.0 }
 0x15b   :  { %1238 = vmatpush3.bf16.msra.mxu1 %v415_v7  ;;  %v387_v15 = vadd.f32 %v1142_v53, %v365_v21  ;;  %v388_v16 = vadd.f32 %v1142_v53, %v366_v8  ;;  %v367_v18 = vmul.f32 %v360_v52, %v1605_v33  ;;  %v412_v19 = vmax.f32 %v396_v3, 0.0  ;;  %v1427_v21 = vld [vmem:[%s1915_s6 + $0x18] sm:$0xff]  }
 0x15c   :  { %1282 = vmatpush3.bf16.msra.mxu0 %v419_v9  ;;  %1239 = vmatprep.subr.bf16.mxu1 %v1442_v13  ;;  %v395_v22 = vadd.f32 %v1142_v53, %v373_v12  ;;  %v368_v30 = vmul.f32 %v360_v52, %v1607_v34  ;;  %v375_v32 = vmul.f32 %v360_v52, %v1621_v31  ;;  %v1444_v58 = vmov 0  }
 0x15d   :  { %1283 = vmatprep.subr.bf16.mxu0 %v1442_v13  ;;  %v420_v24 = vpack.c.bf16 %v410_v38, %v409_v11  ;;  %v403_v25 = vmax.f32 %v387_v15, 0.0  ;;  %v404_v20 = vmax.f32 %v388_v16, 0.0  ;;  %v389_v26 = vadd.f32 %v1142_v53, %v367_v18  ;;  %v1428_v38 = vld [vmem:[%s1915_s6 + $0x20] sm:$0xff]  }
 0x15e   :  { %v411_v35 = vmax.f32 %v395_v22, 0.0  ;;  %v390_v39 = vadd.f32 %v1142_v53, %v368_v30  ;;  %v376_v40 = vmul.f32 %v360_v52, %v1623_v37  ;;  %v397_v33 = vadd.f32 %v1142_v53, %v375_v32  ;;  %v1418_v52 = vld [vmem:[%s1912_s5 + $0x18] sm:$0xff]  }
 0x15f   :  { %1240 = vmatpush3.bf16.msra.mxu1 %v416_v10  ;;  %v417_v41 = vpack.c.bf16 %v404_v20, %v403_v25  ;;  %v405_v42 = vmax.f32 %v389_v26, 0.0  ;;  %v1429_v26 = vld [vmem:[%s1915_s6 + $0x28] sm:$0xff]  }
 0x160   :  { %1284 = vmatpush3.bf16.msra.mxu0 %v420_v24  ;;  %1241 = vmatprep.subr.bf16.mxu1 %v1442_v13  ;;  %v421_v34 = vpack.c.bf16 %v412_v19, %v411_v35  ;;  %v406_v43 = vmax.f32 %v390_v39, 0.0  ;;  %v398_v31 = vadd.f32 %v1142_v53, %v376_v40  ;;  %v413_v44 = vmax.f32 %v397_v33, 0.0  ;;  %v1419_v53 = vld [vmem:[%s1912_s5 + $0x20] sm:$0xff]  }
 0x161   :  { %1285 = vmatprep.subr.bf16.mxu0 %v1442_v13 }
 0x162   :  { %v418_v45 = vpack.c.bf16 %v406_v43, %v405_v42  ;;  %v414_v46 = vmax.f32 %v398_v31, 0.0 }
 0x163   :  { %1242 = vmatpush3.bf16.msra.mxu1 %v417_v41 }
 0x164   :  { %1286 = vmatpush3.bf16.msra.mxu0 %v421_v34  ;;  %1243 = vmatprep.subr.bf16.mxu1 %v1442_v13  ;;  %v422_v37 = vpack.c.bf16 %v414_v46, %v413_v44 }
 0x165   :  { %1287 = vmatprep.subr.bf16.mxu0 %v1442_v13 }
 0x167   :  { %1244 = vmatpush3.bf16.msra.mxu1 %v418_v45  ;;  %v1430_v45 = vld [vmem:[%s1915_s6 + $0x30] sm:$0xff]  }
 0x168   :  { %1288 = vmatpush3.bf16.msra.mxu0 %v422_v37  ;;  %958 = vmatprep.subr.bf16.mxu1 %v1444_v58 }
 0x16a   :  { %1246 = vmatmul.mubr.msk.bf16.vlgmr.msra.gmra.mrb[0].mxu1 %vm486_vm5, %v1415_v48 }
 0x16b   :  { %1290 = vmatmul.mubr.msk.bf16.vlgmr.msra.gmra.mrb[16].mxu0 %vm486_vm5, %v1415_v48  ;;  %1249 = vmatprep.mubr.msk.bf16.mxu1 %vm1443_vm4, %v1442_v13 }
 0x16c   :  { %1293 = vmatprep.mubr.msk.bf16.mxu0 %vm1443_vm4, %v1442_v13  ;;  %959 = vmatpush1.bf16.msra.mxu1 %v1424_v59 }
 0x16d   :  { %960 = vmatprep.subr.bf16.mxu1 %v1444_v58 }
 0x170   :  { %961 = vmatpush1.bf16.msra.mxu1 %v1425_v60 }
 0x171   :  { %962 = vmatprep.subr.bf16.mxu1 %v1444_v58 }
 0x172   :  { %1250 = vmatmul.mubr.msk.bf16.gmra.mrb[4].mxu1 %vm486_vm5, %v1416_v50 }
 0x173   :  { %1294 = vmatmul.mubr.msk.bf16.gmra.mrb[20].mxu0 %vm486_vm5, %v1416_v50  ;;  %1253 = vmatprep.mubr.msk.bf16.mxu1 %vm1443_vm4, %v1442_v13 }
 0x174   :  { %1297 = vmatprep.mubr.msk.bf16.mxu0 %vm1443_vm4, %v1442_v13  ;;  %963 = vmatpush1.bf16.msra.mxu1 %v1426_v23 }
 0x175   :  { %964 = vmatprep.subr.bf16.mxu1 %v1444_v58 }
 0x178   :  { %965 = vmatpush1.bf16.msra.mxu1 %v1427_v21 }
 0x179   :  { %966 = vmatprep.subr.bf16.mxu1 %v1444_v58 }
 0x17a   :  { %1254 = vmatmul.mubr.msk.bf16.gmra.mrb[8].mxu1 %vm486_vm5, %v1417_v51 }
 0x17b   :  { %1298 = vmatmul.mubr.msk.bf16.gmra.mrb[24].mxu0 %vm486_vm5, %v1417_v51  ;;  %1257 = vmatprep.mubr.msk.bf16.mxu1 %vm1443_vm4, %v1442_v13 }
 0x17c   :  { %1301 = vmatprep.mubr.msk.bf16.mxu0 %vm1443_vm4, %v1442_v13  ;;  %967 = vmatpush1.bf16.msra.mxu1 %v1428_v38 }
 0x17d   :  { %968 = vmatprep.subr.bf16.mxu1 %v1444_v58 }
 0x180   :  { %969 = vmatpush1.bf16.msra.mxu1 %v1429_v26 }
 0x181   :  { %970 = vmatprep.subr.bf16.mxu1 %v1444_v58 }
 0x182   :  { %1258 = vmatmul.mubr.msk.bf16.gmra.mrb[12].mxu1 %vm486_vm5, %v1418_v52 }
 0x183   :  { %1261 = vmatprep.mubr.msk.bf16.mxu1 %vm1443_vm4, %v1442_v13  ;;  %1302 = vmatmul.mubr.msk.bf16.gmra.mrb[28].mxu0 %vm486_vm5, %v1418_v52 }
 0x184   :  { %1305 = vmatprep.mubr.msk.bf16.mxu0 %vm1443_vm4, %v1442_v13  ;;  %971 = vmatpush1.bf16.msra.mxu1 %v1430_v45 }
 0x185   :  { %972 = vmatprep.subr.bf16.mxu1 %v1444_v58 }
 0x18a   :  { %1262 = vmatmul.mubr.msk.bf16.gmra.mrb[16].mxu1 %vm486_vm5, %v1419_v53 }
 0x18b   :  { %1265 = vmatprep.mubr.msk.bf16.mxu1 %vm1443_vm4, %v1442_v13  ;;  %1306 = vmatmul.mubr.msk.bf16.gmra.mrb[32].mxu0 %vm486_vm5, %v1419_v53 }
 0x18c   :  { %1309 = vmatprep.mubr.msk.bf16.mxu0 %vm1443_vm4, %v1442_v13 }
 0x192   :  { %1266 = vmatmul.mubr.msk.bf16.gmra.mrb[20].mxu1 %vm486_vm5, %v1420_v54 }
 0x193   :  { %1269 = vmatprep.mubr.msk.bf16.mxu1 %vm1443_vm4, %v1442_v13  ;;  %1310 = vmatmul.mubr.msk.bf16.gmra.mrb[36].mxu0 %vm486_vm5, %v1420_v54 }
 0x194   :  { %1313 = vmatprep.mubr.msk.bf16.mxu0 %vm1443_vm4, %v1442_v13 }
 0x19a   :  { %1270 = vmatmul.mubr.msk.bf16.gmra.mrb[24].mxu1 %vm486_vm5, %v1421_v55 }
 0x19b   :  { %1273 = vmatprep.mubr.msk.bf16.mxu1 %vm1443_vm4, %v1442_v13  ;;  %1314 = vmatmul.mubr.msk.bf16.gmra.mrb[40].mxu0 %vm486_vm5, %v1421_v55 }
 0x19c   :  { %1317 = vmatprep.mubr.msk.bf16.mxu0 %vm1443_vm4, %v1442_v13 }
 0x1a2   :  { %1274 = vmatmul.mubr.msk.bf16.gmra.mrb[28].mxu1 %vm486_vm5, %v1422_v56 }
 0x1a3   :  { %1318 = vmatmul.mubr.msk.bf16.gmra.mrb[44].mxu0 %vm486_vm5, %v1422_v56  ;;  %1277 = vmatprep.mubr.msk.bf16.mxu1 %vm1443_vm4, %v1442_v13 }
 0x1a4   :  { %1321 = vmatprep.mubr.msk.bf16.mxu0 %vm1443_vm4, %v1442_v13 }
 0x1aa   :  { %1278 = vmatmul.mubr.msk.bf16.gmra.mrb[32].mxu1 %vm486_vm5, %v1423_v57 }
 0x1ab   :  { %1322 = vmatmul.mubr.msk.bf16.gmra.mrb[48].mxu0 %vm486_vm5, %v1423_v57 }
 0x23d   :  { %v1792_v13 = vpop.f32.mrb[0].mxu1 }
 0x23e   :  { %v1794_v61 = vpop.f32.mrb[16].mxu0  ;;  %v1247_v62 = vpop.f32.mrb[1].mxu1 }
 0x23f   :  { %v1291_v63 = vpop.f32.mrb[17].mxu0  ;;  %v1796_v0 = vpop.f32.mrb[2].mxu1 }
 0x240   :  { %v1798_v1 = vpop.f32.mrb[18].mxu0  ;;  %v1248_v2 = vpop.f32.mrb[3].mxu1 }
 0x241   :  { %v1292_v27 = vpop.f32.mrb[19].mxu0  ;;  %v1431_v2 = vld [vmem:[%s1915_s6 + $0x38] sm:$0xff]  }
 0x242   :  { %973 = vmatpush1.bf16.msra.mxu1 %v1431_v2 }
 0x243   :  { %974 = vmatprep.subr.bf16.mxu1 %v1444_v58 }
 0x245   :  { %v556_v3 = vpop.f32.mrb[4].mxu1 }
 0x246   :  { %v736_v14 = vpop.f32.mrb[20].mxu0  ;;  %v1251_v4 = vpop.f32.mrb[5].mxu1 }
 0x247   :  { %v1295_v36 = vpop.f32.mrb[21].mxu0  ;;  %v559_v5 = vpop.f32.mrb[6].mxu1 }
 0x248   :  { %v1336_v17 = vpack.i.bf16 %v559_v5, %v556_v3  ;;  %v739_v6 = vpop.f32.mrb[22].mxu0  ;;  %v1252_v28 = vpop.f32.mrb[7].mxu1 }
 0x249   :  { %v1341_v7 = vpack.i.bf16 %v739_v6, %v736_v14  ;;  %v1296_v29 = vpop.f32.mrb[23].mxu0  ;;  %v1432_v6 = vld [vmem:[%s1915_s6 + $0x40] sm:$0xff]  }
 0x24a   :  { %1337 = vrot.lane.b32.xlu0 %v1336_v17, %s1445_s3  ;;  %975 = vmatpush1.bf16.msra.mxu1 %v1432_v6 }
 0x24b   :  { %1342 = vrot.lane.b32.xlu1 %v1341_v7, %s1445_s3 }
 0x24d   :  { %v564_v8 = vpop.f32.mrb[8].mxu1 }
 0x24e   :  { %v1255_v9 = vpop.f32.mrb[9].mxu1  ;;  %v744_v10 = vpop.f32.mrb[24].mxu0 }
 0x24f   :  { %v567_v11 = vpop.f32.mrb[10].mxu1  ;;  %v1299_v12 = vpop.f32.mrb[25].mxu0 }
 0x250   :  { %v1346_v15 = vpack.i.bf16 %v567_v11, %v564_v8  ;;  %v747_v16 = vpop.f32.mrb[26].mxu0  ;;  %v1256_v18 = vpop.f32.mrb[11].mxu1 }
 0x251   :  { %v1351_v19 = vpack.i.bf16 %v747_v16, %v744_v10  ;;  %v1300_v22 = vpop.f32.mrb[27].mxu0 }
 0x252   :  { %1347 = vrot.lane.b32.xlu0 %v1346_v15, %s1446_s27 }
 0x255   :  { %v572_v30 = vpop.f32.mrb[12].mxu1 }
 0x256   :  { %1352 = vrot.lane.b32.xlu0 %v1351_v19, %s1446_s27  ;;  %v1259_v32 = vpop.f32.mrb[13].mxu1  ;;  %v752_v24 = vpop.f32.mrb[28].mxu0 }
 0x257   :  { %v575_v25 = vpop.f32.mrb[14].mxu1  ;;  %v1303_v20 = vpop.f32.mrb[29].mxu0 }
 0x258   :  { %v1356_v35 = vpack.i.bf16 %v575_v25, %v572_v30  ;;  %v1260_v39 = vpop.f32.mrb[15].mxu1  ;;  %v755_v40 = vpop.f32.mrb[30].mxu0 }
 0x259   :  { %v1376_v33 = vpack.i.bf16 %v755_v40, %v752_v24  ;;  %v1304_v41 = vpop.f32.mrb[31].mxu0 }
 0x25a   :  { %1357 = vrot.lane.b32.xlu1 %v1356_v35, %s1447_s29 }
 0x25d   :  { %v580_v42 = vpop.f32.mrb[16].mxu1 }
 0x25e   :  { %v1263_v34 = vpop.f32.mrb[17].mxu1  ;;  %v760_v43 = vpop.f32.mrb[32].mxu0 }
 0x25f   :  { %v583_v31 = vpop.f32.mrb[18].mxu1  ;;  %v1307_v44 = vpop.f32.mrb[33].mxu0 }
 0x260   :  { %v1361_v46 = vpack.i.bf16 %v583_v31, %v580_v42  ;;  %v1264_v37 = vpop.f32.mrb[19].mxu1  ;;  %v763_v48 = vpop.f32.mrb[34].mxu0 }
 0x261   :  { %v1386_v50 = vpack.i.bf16 %v763_v48, %v760_v43  ;;  %v1308_v51 = vpop.f32.mrb[35].mxu0 }
 0x262   :  { %1362 = vrot.lane.b32.xlu1 %v1361_v46, %s1448_s14 }
 0x265   :  { %v588_v52 = vpop.f32.mrb[20].mxu1 }
 0x266   :  { %v1267_v53 = vpop.f32.mrb[21].mxu1  ;;  %v768_v54 = vpop.f32.mrb[36].mxu0 }
 0x267   :  { %v591_v55 = vpop.f32.mrb[22].mxu1  ;;  %v1311_v56 = vpop.f32.mrb[37].mxu0 }
 0x268   :  { %v1366_v57 = vpack.i.bf16 %v591_v55, %v588_v52  ;;  %v1268_v59 = vpop.f32.mrb[23].mxu1  ;;  %v771_v60 = vpop.f32.mrb[38].mxu0 }
 0x269   :  { %v1391_v62 = vpack.i.bf16 %v771_v60, %v768_v54  ;;  %v1312_v63 = vpop.f32.mrb[39].mxu0 }
 0x26a   :  { %1367 = vrot.lane.b32.xlu0 %v1366_v57, %s1449_s15 }
 0x26d   :  { %v596_v23 = vpop.f32.mrb[24].mxu1 }
 0x26e   :  { %v1271_v27 = vpop.f32.mrb[25].mxu1  ;;  %v776_v3 = vpop.f32.mrb[40].mxu0 }
 0x26f   :  { %v599_v14 = vpop.f32.mrb[26].mxu1  ;;  %v1315_v4 = vpop.f32.mrb[41].mxu0 }
 0x270   :  { %v1371_v36 = vpack.i.bf16 %v599_v14, %v596_v23  ;;  %v1272_v5 = vpop.f32.mrb[27].mxu1  ;;  %v779_v17 = vpop.f32.mrb[42].mxu0 }
 0x271   :  { %v1396_v28 = vpack.i.bf16 %v779_v17, %v776_v3  ;;  %v1316_v7 = vpop.f32.mrb[43].mxu0 }
 0x272   :  { %1372 = vrot.lane.b32.xlu1 %v1371_v36, %s1450_s20 }
 0x275   :  { %v604_v29 = vpop.f32.mrb[28].mxu1 }
 0x276   :  { %1377 = vrot.lane.b32.xlu1 %v1376_v33, %s1447_s29  ;;  %v1275_v21 = vpop.f32.mrb[29].mxu1  ;;  %v784_v8 = vpop.f32.mrb[44].mxu0 }
 0x277   :  { %v607_v58 = vpop.f32.mrb[30].mxu1  ;;  %v1319_v9 = vpop.f32.mrb[45].mxu0 }
 0x278   :  { %v1381_v10 = vpack.i.bf16 %v607_v58, %v604_v29  ;;  %v1276_v11 = vpop.f32.mrb[31].mxu1  ;;  %v787_v12 = vpop.f32.mrb[46].mxu0 }
 0x279   :  { %v1401_v38 = vpack.i.bf16 %v787_v12, %v784_v8  ;;  %v1320_v15 = vpop.f32.mrb[47].mxu0 }
 0x27a   :  { %1392 = vrot.lane.b32.xlu1 %v1391_v62, %s1449_s15  ;;  %1382 = vrot.lane.b32.xlu0 %v1381_v10, %s1451_s21 }
 0x27d   :  { %v612_v16 = vpop.f32.mrb[32].mxu1 }
 0x27e   :  { %1387 = vrot.lane.b32.xlu0 %v1386_v50, %s1448_s14  ;;  %1402 = vrot.lane.b32.xlu1 %v1401_v38, %s1451_s21  ;;  %v1279_v18 = vpop.f32.mrb[33].mxu1  ;;  %v1831_v19 = vpop.f32.mrb[48].mxu0 }
 0x27f   :  { %v615_v22 = vpop.f32.mrb[34].mxu1  ;;  %v1323_v30 = vpop.f32.mrb[49].mxu0 }
 0x280   :  { %v870_v32 = vpack.c.bf16 %v615_v22, %v612_v16  ;;  %v1280_v24 = vpop.f32.mrb[35].mxu1  ;;  %v1833_v25 = vpop.f32.mrb[50].mxu0 }
 0x281   :  { %v872_v20 = vpack.c.bf16 %v1833_v25, %v1831_v19  ;;  %v1324_v26 = vpop.f32.mrb[51].mxu0 }
 0x282   :  { %1397 = vrot.lane.b32.xlu0 %v1396_v28, %s1450_s20  ;;  %1180 = vmatprep.mubr.msk.bf16.mxu1 %vm245_vm3, %v870_v32 }
 0x2bc   :  { %v1338_v39 = vpop.permute.xlu0 %1337 }
 0x2bd   :  { %v1343_v35 = vpop.permute.xlu1 %1342  ;;  %v1340_v43 = vunpack.i.h.bf16 %v1338_v39  ;;  %v1339_v31 = vunpack.i.l.bf16 %v1338_v39 }
 0x2be   :  { %v1345_v63 = vunpack.i.h.bf16 %v1343_v35  ;;  %v1344_v2 = vunpack.i.l.bf16 %v1343_v35 }
 0x2bf   :  { %v676_v52 = vsel %vm245_vm3, %v1796_v0, %v1340_v43  ;;  %v675_v53 = vsel %vm245_vm3, %v1792_v13, %v1339_v31 }
 0x2c0   :  { %v856_v10 = vsel %vm245_vm3, %v1798_v1, %v1345_v63  ;;  %v855_v11 = vsel %vm245_vm3, %v1794_v61, %v1344_v2 }
 0x2c4   :  { %v1348_v40 = vpop.permute.xlu0 %1347 }
 0x2c5   :  { %v1350_v44 = vunpack.i.h.bf16 %v1348_v40  ;;  %v1349_v45 = vunpack.i.l.bf16 %v1348_v40 }
 0x2c7   :  { %v679_v57 = vsel %vm677_vm6, %v676_v52, %v1350_v44  ;;  %v678_v59 = vsel %vm677_vm6, %v675_v53, %v1349_v45 }
 0x2c8   :  { %v1353_v42 = vpop.permute.xlu0 %1352 }
 0x2c9   :  { %v1355_v3 = vunpack.i.h.bf16 %v1353_v42  ;;  %v1354_v0 = vunpack.i.l.bf16 %v1353_v42 }
 0x2cb   :  { %v858_v15 = vsel %vm677_vm6, %v856_v10, %v1355_v3  ;;  %v857_v16 = vsel %vm677_vm6, %v855_v11, %v1354_v0 }
 0x2cc   :  { %v1358_v33 = vpop.permute.xlu1 %1357 }
 0x2cd   :  { %v1360_v37 = vunpack.i.h.bf16 %v1358_v33  ;;  %v1359_v48 = vunpack.i.l.bf16 %v1358_v33 }
 0x2cf   :  { %v682_v23 = vsel %vm680_vm7, %v679_v57, %v1360_v37  ;;  %v681_v27 = vsel %vm680_vm7, %v678_v59, %v1359_v48 }
 0x2d4   :  { %v1363_v41 = vpop.permute.xlu1 %1362 }
 0x2d5   :  { %v1365_v50 = vunpack.i.h.bf16 %v1363_v41  ;;  %v1364_v51 = vunpack.i.l.bf16 %v1363_v41 }
 0x2d7   :  { %v684_v14 = vsel %vm486_vm5, %v682_v23, %v1365_v50  ;;  %v683_v13 = vsel %vm486_vm5, %v681_v27, %v1364_v51 }
 0x2dc   :  { %v1368_v46 = vpop.permute.xlu0 %1367 }
 0x2dd   :  { %v1370_v54 = vunpack.i.h.bf16 %v1368_v46  ;;  %v1369_v55 = vunpack.i.l.bf16 %v1368_v46 }
 0x2df   :  { %v687_v36 = vsel %vm685_vm8, %v684_v14, %v1370_v54  ;;  %v686_v5 = vsel %vm685_vm8, %v683_v13, %v1369_v55 }
 0x2e4   :  { %v1373_v34 = vpop.permute.xlu1 %1372 }
 0x2e5   :  { %v1375_v60 = vunpack.i.h.bf16 %v1373_v34  ;;  %v1374_v62 = vunpack.i.l.bf16 %v1373_v34 }
 0x2e7   :  { %v690_v28 = vsel %vm688_vm9, %v687_v36, %v1375_v60  ;;  %v689_v7 = vsel %vm688_vm9, %v686_v5, %v1374_v62 }
 0x2e8   :  { %v1378_v56 = vpop.permute.xlu1 %1377 }
 0x2e9   :  { %v1380_v29 = vunpack.i.h.bf16 %v1378_v56  ;;  %v1379_v21 = vunpack.i.l.bf16 %v1378_v56 }
 0x2eb   :  { %v860_v30 = vsel %vm680_vm7, %v858_v15, %v1380_v29  ;;  %v859_v32 = vsel %vm680_vm7, %v857_v16, %v1379_v21 }
 0x2ec   :  { %v1383_v4 = vpop.permute.xlu0 %1382  ;;  %v1393_v8 = vpop.permute.xlu1 %1392 }
 0x2ed   :  { %v1385_v17 = vunpack.i.h.bf16 %v1383_v4  ;;  %v1384_v6 = vunpack.i.l.bf16 %v1383_v4  ;;  %v1395_v61 = vunpack.i.h.bf16 %v1393_v8  ;;  %v1394_v35 = vunpack.i.l.bf16 %v1393_v8 }
 0x2ef   :  { %v693_v58 = vsel %vm691_vm10, %v690_v28, %v1385_v17  ;;  %v692_v9 = vsel %vm691_vm10, %v689_v7, %v1384_v6 }
 0x2f0   :  { %v869_v12 = vpack.c.bf16 %v693_v58, %v692_v9  ;;  %v1388_v38 = vpop.permute.xlu0 %1387  ;;  %v1403_v26 = vpop.permute.xlu1 %1402 }
 0x2f1   :  { %v1390_v18 = vunpack.i.h.bf16 %v1388_v38  ;;  %v1389_v22 = vunpack.i.l.bf16 %v1388_v38  ;;  %v1405_v34 = vunpack.i.h.bf16 %v1403_v26  ;;  %v1404_v43 = vunpack.i.l.bf16 %v1403_v26 }
 0x2f2   :  { %991 = vmatmul.mubr.bf16.vlgmr.msra.gmra.mrb[36].mxu1 %v869_v12 }
 0x2f3   :  { %v862_v24 = vsel %vm486_vm5, %v860_v30, %v1390_v18  ;;  %v861_v1 = vsel %vm486_vm5, %v859_v32, %v1389_v22  ;;  %1181 = vmatprep.mubr.msk.bf16.mxu1 %vm245_vm3, %v872_v20  ;;  %v1170_v20 = vld [vmem:[%s1916_s7] ss:$0 sm:$0xff] }
 0x2f4   :  { %v1398_v39 = vpop.permute.xlu0 %1397  ;;  %v863_v41 = vsel %vm685_vm8, %v861_v1, %v1394_v35  ;;  %v864_v42 = vsel %vm685_vm8, %v862_v24, %v1395_v61 }
 0x2f5   :  { %v1400_v40 = vunpack.i.h.bf16 %v1398_v39  ;;  %v1399_v33 = vunpack.i.l.bf16 %v1398_v39  ;;  %v1007_v39 = vld [vmem:[%s1917_s8] sm:$0x1] }
 0x2f7   :  { %v865_v31 = vsel %vm688_vm9, %v863_v41, %v1399_v33  ;;  %v866_v44 = vsel %vm688_vm9, %v864_v42, %v1400_v40  ;;  %v1182_v42 = vld [vmem:[%s1918_s9] ss:$0 sm:$0xff] }
 0x2f8   :  { %v867_v45 = vsel %vm691_vm10, %v865_v31, %v1404_v43  ;;  %v868_v19 = vsel %vm691_vm10, %v866_v44, %v1405_v34 }
 0x2f9   :  { %v871_v25 = vpack.c.bf16 %v868_v19, %v867_v45 }
 0x2fb   :  { %999 = vmatmul.mubr.bf16.gmra.mrb[40].mxu1 %v871_v25 }
 0x3c5   :  { %v992_v46 = vpop.f32.mrb[36].mxu1 }
 0x3c6   :  { %v993_v37 = vadd.f32 %v1170_v20, %v992_v46  ;;  %v994_v48 = vpop.f32.mrb[37].mxu1 }
 0x3c7   :  { %v995_v50 = vpop.f32.mrb[38].mxu1 }
 0x3c8   :  { %v996_v51 = vadd.f32 %v1170_v20, %v995_v50  ;;  %v997_v52 = vpop.f32.mrb[39].mxu1  ;;  %v1009_v53 = vsel %vm677_vm6, %v993_v37, 0.0 }
 0x3ca   :  { %v1010_v54 = vsel %vm677_vm6, %v996_v51, 0.0 }
 0x3cb   :  { %v1011_v55 = vadd.f32 %v1010_v54, %v1009_v53 }
 0x3ce   :  { %v1000_v56 = vpop.f32.mrb[40].mxu1 }
 0x3cf   :  { %v1001_v57 = vadd.f32 %v1170_v20, %v1000_v56  ;;  %v1002_v59 = vpop.f32.mrb[41].mxu1 }
 0x3d0   :  { %v1003_v60 = vpop.f32.mrb[42].mxu1 }
 0x3d1   :  { %v1012_v62 = vsel %vm677_vm6, %v1001_v57, 0.0  ;;  %v1004_v63 = vadd.f32 %v1170_v20, %v1003_v60  ;;  %v1005_v2 = vpop.f32.mrb[43].mxu1  ;;  %v1071_v20 = vld [vmem:[%s1919_s10 + $0x8] sm:$0xff]  ;;  %v17_v60 = vstv %s1920_s11 }
 0x3d2   :  { %v1013_v23 = vadd.f32 %v1012_v62, %v1011_v55  ;;  %18 = vst [vmem:[#allocation2] sm:$0x1] %v17_v60 }
 0x3d3   :  { %v1014_v27 = vsel %vm677_vm6, %v1004_v63, 0.0 }
 0x3d4   :  { %v1015_v3 = vadd.f32 %v1014_v27, %v1013_v23 }
 0x3d6   :  { %v1016_v0 = vrot.slane %v1015_v3, 4 }
 0x3d8   :  { %v1017_v14 = vadd.f32 %v1016_v0, %v1015_v3 }
 0x3da   :  { %v1018_v13 = vrot.slane %v1017_v14, 2 }
 0x3dc   :  { %v1019_v4 = vadd.f32 %v1018_v13, %v1017_v14 }
 0x3de   :  { %v1020_v36 = vrot.slane %v1019_v4, 1 }
 0x3e0   :  { %v1021_v5 = vadd.f32 %v1020_v36, %v1019_v4 }
 0x3e2   :  { %v1022_v17 = vmul.f32 0.03125, %v1021_v5 }
 0x3e4   :  { %v1023_v6 = vsub.f32 %v993_v37, %v1022_v17  ;;  %v1024_v28 = vsub.f32 %v996_v51, %v1022_v17  ;;  %v1025_v7 = vsub.f32 %v1001_v57, %v1022_v17  ;;  %v1026_v29 = vsub.f32 %v1004_v63, %v1022_v17 }
 0x3e6   :  { %v1027_v21 = vmul.f32 %v1023_v6, %v1023_v6  ;;  %v1028_v8 = vmul.f32 %v1024_v28, %v1024_v28  ;;  %v1029_v58 = vmul.f32 %v1025_v7, %v1025_v7  ;;  %v1030_v9 = vmul.f32 %v1026_v29, %v1026_v29 }
 0x3e8   :  { %v1031_v10 = vsel %vm677_vm6, %v1027_v21, 0.0  ;;  %v1032_v11 = vsel %vm677_vm6, %v1028_v8, 0.0  ;;  %v1034_v38 = vsel %vm677_vm6, %v1029_v58, 0.0  ;;  %v1036_v16 = vsel %vm677_vm6, %v1030_v9, 0.0  ;;  %v1183_v21 = vld [vmem:[#allocation2] ss:$0 sm:$0xff] }
 0x3e9   :  { %v1033_v12 = vadd.f32 %v1032_v11, %v1031_v10 }
 0x3eb   :  { %v1035_v15 = vadd.f32 %v1034_v38, %v1033_v12 }
 0x3ed   :  { %v1037_v18 = vadd.f32 %v1036_v16, %v1035_v15 }
 0x3ef   :  { %v1038_v22 = vrot.slane %v1037_v18, 4 }
 0x3f1   :  { %v1039_v30 = vadd.f32 %v1038_v22, %v1037_v18 }
 0x3f3   :  { %v1040_v32 = vrot.slane %v1039_v30, 2 }
 0x3f5   :  { %v1041_v24 = vadd.f32 %v1040_v32, %v1039_v30 }
 0x3f7   :  { %v1042_v1 = vrot.slane %v1041_v24, 1 }
 0x3f9   :  { %v1043_v26 = vadd.f32 %v1042_v1, %v1041_v24 }
 0x3fb   :  { %v1044_v61 = vmul.f32 0.03125, %v1043_v26 }
 0x3fd   :  { %v1045_v35 = vadd.f32 1e-05, %v1044_v61 }
 0x3ff   :  { %1435 = vrsqrt.f32 %v1045_v35 }
 0x409   :  { %v1436_v40 = vpop.eup %1435 }
 0x40a   :  { %v1047_v33 = vmul.f32 %v1436_v40, %v1007_v39 }
 0x40c   :  { %v1051_v41 = vrot.slane %v1047_v33, %v359_v49 }
 0x40e   :  { %v1055_v34 = vmul.f32 %v1051_v41, %v1026_v29  ;;  %v1053_v43 = vmul.f32 %v1051_v41, %v1024_v28  ;;  %v1052_v31 = vmul.f32 %v1051_v41, %v1023_v6  ;;  %v1054_v44 = vmul.f32 %v1051_v41, %v1025_v7 }
 0x410   :  { %v1063_v45 = vadd.f32 %v1182_v42, %v1053_v43  ;;  %v1062_v19 = vadd.f32 %v1182_v42, %v1052_v31  ;;  %v1064_v25 = vadd.f32 %v1182_v42, %v1054_v44  ;;  %v1065_v48 = vadd.f32 %v1182_v42, %v1055_v34 }
 0x412   :  { %v1067_v49 = vmax.f32 %v1063_v45, 0.0  ;;  %v1066_v46 = vmax.f32 %v1062_v19, 0.0  ;;  %v1068_v37 = vmax.f32 %v1064_v25, 0.0  ;;  %v1069_v55 = vmax.f32 %v1065_v48, 0.0 }
 0x414   :  { %v1073_v50 = vmul.f32 %v1071_v20, %v1067_v49  ;;  %v1072_v51 = vmul.f32 %v1070_v47, %v1066_v46  ;;  %v1087_v54 = vmul.f32 %v1070_v47, %v1068_v37  ;;  %v1088_v57 = vmul.f32 %v1071_v20, %v1069_v55 }
 0x416   :  { %v1077_v52 = vsel %vm677_vm6, %v1073_v50, 0.0  ;;  %v1074_v53 = vsel %vm677_vm6, %v1072_v51, 0.0  ;;  %v1089_v56 = vsel %vm677_vm6, %v1087_v54, 0.0  ;;  %v1092_v59 = vsel %vm677_vm6, %v1088_v57, 0.0 }
 0x417   :  { %1078 = vadd.xlane.f32.xlu1 %v1077_v52  ;;  %1075 = vadd.xlane.f32.xlu0 %v1074_v53 }
 0x41b   :  { %1090 = vadd.xlane.f32.xlu0 %v1089_v56 }
 0x41f   :  { %1093 = vadd.xlane.f32.xlu0 %v1092_v59 }
 0x4a4   :  { %v1079_v62 = vpop.xlane.xlu1 %1078  ;;  %v1076_v63 = vpop.xlane.xlu0 %1075 }
 0x4a5   :  { %v1080_v2 = vadd.f32 %v1079_v62, %v1076_v63 }
 0x4a7   :  { %v1081_v23 = vrot.slane %v1080_v2, 4 }
 0x4a8   :  { %v1091_v27 = vpop.xlane.xlu0 %1090 }
 0x4a9   :  { %v1082_v3 = vadd.f32 %v1081_v23, %v1080_v2 }
 0x4ab   :  { %v1083_v14 = vrot.slane %v1082_v3, 2 }
 0x4ac   :  { %v1094_v0 = vpop.xlane.xlu0 %1093 }
 0x4ad   :  { %v1095_v13 = vadd.f32 %v1094_v0, %v1091_v27  ;;  %v1084_v36 = vadd.f32 %v1083_v14, %v1082_v3 }
 0x4af   :  { %v1096_v4 = vrot.slane %v1095_v13, 4  ;;  %v1085_v6 = vrot.slane %v1084_v36, 1 }
 0x4b1   :  { %v1097_v5 = vadd.f32 %v1096_v4, %v1095_v13  ;;  %v1086_v29 = vadd.f32 %v1085_v6, %v1084_v36 }
 0x4b3   :  { %v1098_v17 = vrot.slane %v1097_v5, 2 }
 0x4b5   :  { %v1099_v28 = vadd.f32 %v1098_v17, %v1097_v5 }
 0x4b7   :  { %v1100_v7 = vrot.slane %v1099_v28, 1 }
 0x4b9   :  { %v1101_v8 = vadd.f32 %v1100_v7, %v1099_v28 }
 0x4bb   :  { %v1103_v58 = vsel %vm1102_vm11, %v1086_v29, %v1101_v8 }
 0x4bc   :  { %v1111_v9 = vadd.f32 %v1183_v21, %v1103_v58 }
 0x4be   :  { %v1112_v10 = vsub.f32 0.0, %v1111_v9 }
 0x4c0   :  { %v1113_v11 = vmul.f32 1.442695, %v1112_v10 }
 0x4c2   :  { %1437 = vpow2.f32 %v1113_v11 }
 0x4cc   :  { %v1438_v12 = vpop.eup %1437 }
 0x4cd   :  { %v1115_v38 = vadd.f32 1.0, %v1438_v12 }
 0x4cf   :  { %1439 = vrcp.f32 %v1115_v38 }
 0x4d9   :  { %v1440_v15 = vpop.eup %1439 }
 0x4da   :  { %1119 = vst.msk [vmem:[%s1921_s12] sm:$0x3] %vm1118_vm12, %v1440_v15 }

</bundles_post_ra>
